<compile_context>
chip_gen: v7x
topology: tpu7x:2x2x1
jax: 0.10.0
libtpu: 0.0.40
codegen_flags: <defaults>
</compile_context>

<pallas_src>
import jax
import jax.numpy as jnp
from jax.experimental import pallas as pl
from jax.experimental.pallas import tpu as pltpu


# --------------------------------------------------------------------------
# Pallas kernel
# --------------------------------------------------------------------------

def _implicit_a_kernel(x_ref, imp_ref, out_ref):
    """Broadcast per-channel add.

    x_ref  : (1, C, HW)  one batch element, channels on sublanes, HW on lanes
    imp_ref: (1, C, 1)   per-channel implicit bias (broadcast across lanes)
    out_ref: (1, C, HW)
    """
    out_ref[...] = x_ref[...] + imp_ref[...]


# --------------------------------------------------------------------------
# Wrapper
# --------------------------------------------------------------------------

def implicit_a(x_nchw, implicit):
    """ImplicitA forward: implicit + x.

    x_nchw  : (B, C, H, W)
    implicit: (1, C, 1, 1)
    returns : (B, C, H, W)
    """
    B, C, H, W = x_nchw.shape
    HW = H * W

    # Free, contiguous reshapes at the XLA level (no data movement).
    x2 = x_nchw.reshape(B, C, HW)
    imp = implicit.reshape(1, C, 1).astype(x_nchw.dtype)

    out = pl.pallas_call(
        _implicit_a_kernel,
        out_shape=jax.ShapeDtypeStruct((B, C, HW), x_nchw.dtype),
        grid_spec=pltpu.PrefetchScalarGridSpec(
            num_scalar_prefetch=0,
            grid=(B,),
            in_specs=[
                # Whole (C, HW) slab per batch element: last dim lane-dense.
                pl.BlockSpec((1, C, HW), lambda b: (b, 0, 0)),
                # Grid-invariant implicit bias block.
                pl.BlockSpec((1, C, 1), lambda b: (0, 0, 0)),
            ],
            out_specs=pl.BlockSpec((1, C, HW), lambda b: (b, 0, 0)),
        ),
        compiler_params=pltpu.CompilerParams(
            dimension_semantics=("parallel",),
        ),
    )(x2, imp)

    return out.reshape(B, C, H, W)


# --------------------------------------------------------------------------
# Pure-JAX reference (mirrors the PyTorch forward exactly)
# --------------------------------------------------------------------------

def ref_implicit_a(x_nchw, implicit):
    return implicit + x_nchw


# --------------------------------------------------------------------------

if __name__ == "__main__":
    key = jax.random.PRNGKey(0)

    # Small shapes consistent with the module: channel=4, batch=2, spatial=16.
    B, C, H, W = 2, 4, 16, 16
    MEAN, STD = 0.0, 0.02   # nn.init.normal_(self.implicit, mean=0.0, std=0.02)

    k_imp, k_x = jax.random.split(key, 2)
    implicit = MEAN + STD * jax.random.normal(k_imp, (1, C, 1, 1), jnp.float32)
    x = jax.random.normal(k_x, (B, C, H, W), jnp.float32)

    out = implicit_a(x, implicit)
    jax.block_until_ready(out)

    ref = ref_implicit_a(x, implicit)
    assert out.shape == ref.shape, f"shape mismatch: {out.shape} vs {ref.shape}"
    assert out.dtype == ref.dtype, f"dtype mismatch: {out.dtype} vs {ref.dtype}"
    assert jnp.allclose(out, ref, rtol=1e-6, atol=1e-6), "ImplicitA output mismatch"

    print("KERNEL_OK")
</pallas_src>

<mosaic_0001>
module attributes {stable_mosaic.version = 11 : i64} {
  func.func @_implicit_a_kernel(%arg0: i32, %arg1: memref<1x4x256xf32, #tpu.memory_space<vmem>>, %arg2: memref<1x4x1xf32, #tpu.memory_space<vmem>>, %arg3: memref<1x4x256xf32, #tpu.memory_space<vmem>>) attributes {dimension_semantics = [#tpu.dimension_semantics<parallel>], iteration_bounds = array<i64: 2>, scalar_prefetch = 0 : i64, scratch_operands = 0 : i64, tpu.core_type = #tpu.core_type<tc>, window_params = [{transform_indices = @transform_0, window_bounds = array<i64: 1, 4, 256>}, {pipeline_mode = #tpu.pipeline_mode<synchronous>, transform_indices = @transform_1, window_bounds = array<i64: 1, 4, 1>}, {transform_indices = @transform_2, window_bounds = array<i64: 1, 4, 256>}]} {
    %c0 = arith.constant 0 : index
    %c0_0 = arith.constant 0 : index
    %c0_1 = arith.constant 0 : index
    %0 = vector.load %arg1[%c0, %c0_0, %c0_1] : memref<1x4x256xf32, #tpu.memory_space<vmem>>, vector<1x4x256xf32>
    %c0_2 = arith.constant 0 : index
    %c0_3 = arith.constant 0 : index
    %c0_4 = arith.constant 0 : index
    %1 = vector.load %arg2[%c0_2, %c0_3, %c0_4] : memref<1x4x1xf32, #tpu.memory_space<vmem>>, vector<1x4x1xf32>
    %2 = vector.broadcast %1 : vector<1x4x1xf32> to vector<1x4x256xf32>
    %3 = arith.addf %0, %2 : vector<1x4x256xf32>
    %c0_5 = arith.constant 0 : index
    %c0_6 = arith.constant 0 : index
    %c0_7 = arith.constant 0 : index
    %4 = vector.load %arg3[%c0_5, %c0_6, %c0_7] : memref<1x4x256xf32, #tpu.memory_space<vmem>>, vector<1x4x256xf32>
    tpu.vector_store %arg3[%c0_5, %c0_6, %c0_7], %3 {strides = array<i32>} : memref<1x4x256xf32, #tpu.memory_space<vmem>>, vector<1x4x256xf32>,
    return
  }
  func.func @transform_0(%arg0: i32) -> (i32, i32, i32) {
    %c0_i32 = arith.constant 0 : i32
    %c0_i32_0 = arith.constant 0 : i32
    %c0_i32_1 = arith.constant 0 : i32
    return %arg0, %c0_i32, %c0_i32_0 : i32, i32, i32
  }
  func.func @transform_1(%arg0: i32) -> (i32, i32, i32) {
    %c0_i32 = arith.constant 0 : i32
    %c0_i32_0 = arith.constant 0 : i32
    %c0_i32_1 = arith.constant 0 : i32
    %c0_i32_2 = arith.constant 0 : i32
    return %c0_i32, %c0_i32_0, %c0_i32_1 : i32, i32, i32
  }
  func.func @transform_2(%arg0: i32) -> (i32, i32, i32) {
    %c0_i32 = arith.constant 0 : i32
    %c0_i32_0 = arith.constant 0 : i32
    %c0_i32_1 = arith.constant 0 : i32
    return %arg0, %c0_i32, %c0_i32_0 : i32, i32, i32
  }
}

</mosaic_0001>

<bundles_post_ra>
// kernel: tpu_custom_call.1
= control target key start
LH: loop header
LB: loop body
LE: loop exit
PB: predicated region body
PF: predicated region fallthrough
CT: control target
= control target key end

     0   :  { %7 = vsyncpa [#allocation3], 0  ;;  %s607_s0 = inlined_call_operand.hbm [shape: f32[2,4,256], index: 0, kind: input, shape index: {}]   ;;  %s608_s1 = inlined_call_operand.vmem [shape: f32[1,4,1], index: 1, kind: input, shape index: {}]   ;;  %s609_s2 = inlined_call_operand.hbm [shape: f32[2,4,256], index: 2, kind: output, shape index: {}]  }
   0x1   :  { %9 = vsyncpa [#allocation3 + $0x1], 0 }
   0x2   :  { %10 = vsyncpa [#allocation4], 0 }
   0x3   :  { %12 = vsyncpa [#allocation4 + $0x1], 0  ;;  %s443_s9 = smov 0   ;;  %s445_s10 = smov 0  }
   0x4   :  { %s447_s11 = smov 0   ;;  %s449_s12 = smov 0  }
   0x5 LB: > { %s464_s13 = sadd.s32 4294967295, %s422_s12   ;;  %s261_s14 = sadd.s32 4294967294, %s422_s12   ;;  %s422_s12 = sphi %s449_s12, %s624_s12   ;;  %s418_s11 = sphi %s447_s11, %s623_s11   ;;  %s414_s10 = sphi %s445_s10, %s622_s10   ;;  %s410_s9 = sphi %s443_s9, %s621_s9  }
   0x6   : > { %s468_s15 = sadd.s32 1, %s422_s12   ;;  %s25_s16 = sadd.s32 1, %s418_s11 }
   0x7   : > { %s22_s17 = ssub.s32 %s422_s12, %s468_s15  ;;  %p32_p0 = scmp.ne.s32.totalorder %s418_s11, %s414_s10 }
   0x8   : > { %p23_p1 = scmp.eq.s32.totalorder %s22_s17, 0  ;;  %p33_p2 = scmp.eq.s32.totalorder %s422_s12, 0 }
   0x9   : > { %p38_p3 = scmp.ne.s32.totalorder %s414_s10, %s410_s9  ;;  %p39_p4 = scmp.eq.s32.totalorder %s464_s13, 0 }
   0xa   : > { %s480_s18 = scalar_select %p23_p1, %s418_s11, %s25_s16  }
   0xb   : > { %p482_p5 = por %p33_p2, %p32_p0  ;;  %p486_p6 = por %p39_p4, %p38_p3 }
   0xc   : > { %p83_p7 = scmp.eq.s32.totalorder %s464_s13, 1  ;;  %p89_p8 = scmp.eq.s32.totalorder %s261_s14, 1 }
   0xd   : > { %p289_p10 = scmp.lt.s32.totalorder %s422_s12, 2  ;;  %s112_s23 = sand.u32 1, %s418_s11  }
   0xe   : > { %p493_p11 = por %p83_p7, %p32_p0  ;;  %p497_p12 = por %p89_p8, %p38_p3 }
   0xf   : > { %s275_s24 = sshll.u32 %s422_s12, 7  ;;  %s264_s25 = sshll.u32 %s112_s23, 3 }
  0x10   : > { %s613_s21 = scalar_select %p493_p11, 1, 0 }
  0x11   : > { %s614_s22 = scalar_select %p497_p12, 1, 0 }
  0x12   : > { %s506_s28 = scalar_lea.hbm %s607_s0, %s275_s24  ;;  %s116_s29 = scalar_lea.vmem [#allocation2], %s264_s25 }
  0x13   : > { %s124_s30 = sshll.u32 %s116_s29, 4  ;;  %p510_p13 = pnand %p289_p10, %p482_p5  ;;  %s514_s30 = int_to_ptr.vmem [resolvable:$true] %s124_s30 }
  0x14   : > { %s113_s4 = scalar_lea.sflag [#allocation3], %s112_s23  ;;  %s326_s5 = scalar_lea.hbm %s506_s28, 128 }
  0x15   : > { %p327_p2 = scmp.ne.s32.totalorder %s506_s28, %s326_s5  ;;  %p328_p3 = pneg %p510_p13 }
  0x16   : > { %s331_s8 = scalar_lea.hbm %s607_s0, 256  ;;  %p332_p5 = scmp.lt.u32.totalorder %s506_s28, %s607_s0 }
  0x17   : > { %p329_p4 = pnand %p328_p3, %p327_p2  ;;  %p333_p8 = scmp.lt.u32.totalorder %s331_s8, %s326_s5 }
  0x18   : > { %p335_p9 = scmp.lt.u32.totalorder %s326_s5, %s506_s28 }
  0x19   : > { %p330_p7 = pneg %p329_p4  ;;  %p334_p10 = por %p333_p8, %p332_p5 }
  0x1b   : > { %p336_p0 = por %p335_p9, %p334_p10 }
  0x1d   : > { %p337_p1 = pnand %p336_p0, %p330_p7 }
  0x1f   : > { %340 = shalt.err (!%p337_p1)
}
  0x20   : > { %s341_s17 = scalar_lea.vmem %s514_s30, 128  ;;  %s424_s19 = smov [#allocation2]  }
  0x21   : > { %p342_p2 = scmp.ne.s32.totalorder %s514_s30, %s341_s17  ;;  %s346_s23 = sshll.u32 %s424_s19, 4  ;;  %s347_s23 = int_to_ptr.vmem [resolvable:$false] %s346_s23 }
  0x22   : > { %s348_s24 = scalar_lea.vmem %s347_s23, 256  ;;  %p349_p11 = scmp.lt.s32.totalorder %s514_s30, %s347_s23 }
  0x23   : > { %p344_p4 = pnand %p342_p2, %p328_p3  ;;  %p350_p5 = scmp.lt.s32.totalorder %s348_s24, %s341_s17 }
  0x25   : > { %p345_p12 = pneg %p344_p4  ;;  %p351_p8 = por %p350_p5, %p349_p11 }
  0x27   : > { %p352_p9 = pnand %p351_p8, %p345_p12 }
  0x29   : > { %355 = shalt.err (!%p352_p9)
}
  0x2a   : > { %284 = dma.hbm_to_vmem [thread:$0]  (!%p510_p13), %s506_s28, 128, %s514_s30, %s113_s4  }
  0x2b   : > { %p616_p0 = scmp.lt.s32.totalorder %s422_s12, 3  ;;  %p617_p1 = scmp.ge.s32.totalorder %s422_s12, 1 }
  0x2d   : > { %p130_p3 = pnand %p617_p1, %p616_p0 }
  0x2e   : > { %s548_s25 = sand.u32 (!%p130_p3), 1, %s414_s10  }
  0x2f   : > { %133 = sbr.rel (%p130_p3) target bundleno = 203 (0xcb), region = 28  ;;  %s268_s26 = sshll.u32 (!%p130_p3), %s548_s25, 3 }
  0x30   : > { %s136_s27 = scalar_lea.sflag (!%p130_p3), [#allocation3], %s548_s25  ;;  %s139_s29 = scalar_lea.vmem (!%p130_p3), [#allocation2], %s268_s26 }
  0x36   : > { %401 = dma.done.wait (%p486_p6), %s136_s27, 128  }
  0x37   : > { %403 = vsyncadd (%p486_p6), %s136_s27, 4294967168  ;;  %v425_v0 = vmov 0   ;;  %v161_v1 = vld [vmem:[%s608_s1] sm:$0xf]  ;;  %v426_v2 = vmov 839922192   ;;  %v169_v4 = vlaneseq }
  0x38   : > { %325 = vset.pattern.permute.xlu0 %v425_v0  ;;  %v167_v3 = vunpack.c.l.s4 %v426_v2  ;;  %v160_v9 = vld [vmem:[%s139_s29] sm:$0xff]  ;;  %s276_s20 = sshll.u32 %s464_s13, 7  ;;  %s159_s3 = scalar_lea.vmem [#allocation5], %s268_s26 }
  0x39   : > { %164 = vperm.xlu0 %325, %v161_v1   ;;  %v170_v6 = vshrl.u32 %v169_v4, 7  ;;  %s191_s4 = sshll.u32 %s159_s3, 4  ;;  %s563_s7 = scalar_lea.hbm %s609_s2, %s276_s20  ;;  %s565_s4 = int_to_ptr.vmem [resolvable:$true] %s191_s4 }
  0x3a   : > { %v168_v5 = vunpack.c.0.s8 %v167_v3  ;;  %s177_s8 = scalar_lea.sflag [#allocation4], %s548_s25  ;;  %s356_s14 = scalar_lea.vmem %s565_s4, 128 }
  0x3b   : > { %p357_p6 = scmp.ne.s32.totalorder %s565_s4, %s356_s14  ;;  %p618_p11 = scmp.ne.s32.totalorder %s613_s21, 0 }
  0x3c   : > { %v171_v7 = vsub.s32 %v168_v5, %v170_v6  ;;  %s427_s13 = smov [#allocation5]  }
  0x3d   : > { %p358_p12 = pnand %p357_p6, %p618_p11  ;;  %s360_s16 = sshll.u32 %s427_s13, 4  ;;  %s361_s16 = int_to_ptr.vmem [resolvable:$false] %s360_s16 }
  0x3e   : > { %s362_s17 = scalar_lea.vmem %s361_s16, 256  ;;  %p363_p7 = scmp.lt.s32.totalorder %s565_s4, %s361_s16 }
  0x3f   : > { %p359_p13 = pneg %p358_p12  ;;  %p364_p10 = scmp.lt.s32.totalorder %s362_s17, %s356_s14 }
  0x41   : > { %p365_p2 = por %p364_p10, %p363_p7 }
  0x43   : > { %p366_p4 = pnand %p365_p2, %p359_p13 }
  0xb8   : > { %v165_v8 = vpop.permute.xlu0 %164 }
  0xb9   : > { %v172_v10 = vrot.slane %v165_v8, %v171_v7 }
  0xbb   : > { %v174_v11 = vadd.f32 %v172_v10, %v160_v9 }
  0xbd   : > { %175 = vst [vmem:[%s159_s3] sm:$0xff] %v174_v11 }
  0xbe   : > { %369 = shalt.err (!%p366_p4)
}
  0xbf   : > { %s370_s19 = scalar_lea.hbm %s563_s7, 128  ;;  %s374_s25 = scalar_lea.hbm %s609_s2, 256 }
  0xc0   : > { %p371_p5 = scmp.ne.s32.totalorder %s563_s7, %s370_s19  ;;  %p375_p0 = scmp.lt.u32.totalorder %s563_s7, %s609_s2 }
  0xc1   : > { %p376_p1 = scmp.lt.u32.totalorder %s374_s25, %s370_s19  ;;  %p378_p6 = scmp.lt.u32.totalorder %s370_s19, %s563_s7 }
  0xc2   : > { %p372_p8 = pnand %p371_p5, %p618_p11 }
  0xc3   : > { %p377_p3 = por %p376_p1, %p375_p0 }
  0xc4   : > { %p373_p9 = pneg %p372_p8 }
  0xc5   : > { %p379_p12 = por %p378_p6, %p377_p3 }
  0xc7   : > { %p380_p13 = pnand %p379_p12, %p373_p9 }
  0xc9   : > { %383 = shalt.err (!%p380_p13)
}
  0xca   : > { %279 = dma.vmem_to_hbm [thread:$0]  (%p618_p11), %s565_s4, 128, %s563_s7, %s177_s8  }
  0xcb PF: > { %s203_s29 = sand.u32 1, %s410_s9   ;;  %p619_p7 = scmp.ne.s32.totalorder %s614_s22, 0 }
  0xcc   : > { %p620_p10 = scmp.ge.s32.totalorder %s422_s12, 2  ;;  %s204_s28 = scalar_lea.sflag [#allocation4], %s203_s29 }
  0xce   : > { %p286_p2 = pnand %p620_p10, %p619_p7 }
  0xd0   : > { %405 = dma.done.wait (!%p286_p2), %s204_s28, 128  }
  0xd1   : > { %407 = vsyncadd (!%p286_p2), %s204_s28, 4294967168  ;;  %p15_p4 = scmp.ge.s32.totalorder %s468_s15, 4   ;;  %s621_s9 = smov %s414_s10 }
  0xd2   : > { %s622_s10 = smov %s418_s11  ;;  %s623_s11 = smov %s480_s18 }
  0xd3   : > { %s624_s12 = smov %s468_s15  ;;  %17 = sbr.rel (!%p15_p4) target bundleno = 5 (0x5), region = 73 }
  0xda   :  { %209 = vsyncpa [#allocation3], 1 }
  0xdb   :  { %211 = vsyncpa [#allocation3 + $0x1], 1 }
  0xdc   :  { %212 = vsyncpa [#allocation4], 1 }
  0xdd   :  { %214 = vsyncpa [#allocation4 + $0x1], 1 }

</bundles_post_ra>
